<compile_context>
chip_gen: v6e
topology: v6e:2x2x1
jax: 0.10.0
libtpu: 0.0.40
codegen_flags: <defaults>
</compile_context>

<pallas_src>
import jax
import jax.numpy as jnp
import numpy as np
from jax.experimental import pallas as pl
from jax.experimental.pallas import tpu as pltpu

ALPHA = 0.5   # SoftmaxFocalLoss alpha
GAMMA = 3     # SoftmaxFocalLoss gamma (== 3 -> implemented as a cube)
NUM_CH = 7    # channel 0 = classification, channels 1..6 = localization


def _pixor_loss_kernel(scale_ref, p_ref, t_ref, cls_out_ref, loc_out_ref):
    # scale_ref : (2, TL) f32 -- row 0: -alpha on valid cls lanes else 0
    #                           row 1:  1.0  on valid loc lanes else 0 (padding -> 0)
    # p_ref/t_ref : (H, TL) block, lane-dense (W-major, channel-minor)
    # cls_out_ref / loc_out_ref : (1, 1) per-(batch, lane-tile) partial sums
    p = p_ref[...].astype(jnp.float32)
    t = t_ref[...].astype(jnp.float32)
    scales = scale_ref[...]
    cls_scale = scales[0:1, :]
    loc_scale = scales[1:2, :]

    # ---------------- SoftmaxFocalLoss (alpha=0.5, gamma=3, reduce=False) ----------
    # Softmax over H (torch dim=1 of the [B, H, W] cls slice). Computed on every lane;
    # non-cls / padded lanes are zeroed at the row level by cls_scale (onehot is also
    # 0 there, so padding contributes exactly 0).
    m = jnp.max(p, axis=0, keepdims=True)            # (1, TL)
    pm = p - m                                       # (H, TL)
    e = jnp.exp(pm)                                  # EUP
    den = jnp.sum(e, axis=0, keepdims=True)          # (1, TL)
    p_soft = e * (1.0 / den)                         # exact reciprocal: row op
    log_p = pm - jnp.log(den)                        # log-softmax (no per-element log)
    onehot = jnp.maximum(t, 0.0)                     # == t * (t >= 0)
    om = 1.0 - p_soft
    # torch: -alpha * (onehot*(1-p)^3) * (onehot*log(p)) * mask ; mask is redundant
    # given onehot, and -alpha is folded into cls_scale below.
    fl = (onehot * onehot) * (om * om * om) * log_p
    fl_row = jnp.sum(fl, axis=0, keepdims=True)      # (1, TL) sublane reduce
    cls_out_ref[...] = jnp.sum(fl_row * cls_scale, axis=1, keepdims=True)

    # ---------------- SmoothL1 (beta=1.0, 'sum' reduction), loc lanes only ---------
    d = p - t
    ad = jnp.abs(d)
    sl1 = jnp.where(ad < 1.0, 0.5 * (d * d), ad - 0.5)
    sl1_row = jnp.sum(sl1, axis=0, keepdims=True)    # (1, TL)
    loc_out_ref[...] = jnp.sum(sl1_row * loc_scale, axis=1, keepdims=True)


def _vmem_capacity_bytes():
    try:
        return int(pltpu.get_tpu_info().vmem_capacity_bytes)
    except Exception:
        return 64 * 1024 * 1024  # conservative (v7x per-TC); v5e/v6e have 128 MiB


def _pick_tile_lanes(H, Lp, itemsize, B, input_budget, min_steps=8, min_lanes=512):
    """Pick TL: a multiple of 128 dividing Lp, whose double-buffered input working set
    fits `input_budget`, preferring the largest tile that still yields >= min_steps
    grid steps (for DMA/compute pipelining); never shrink below ~min_lanes lanes."""
    n128 = Lp // 128
    tiles = [128 * k for k in range(1, n128 + 1) if n128 % k == 0]

    def working_set(tl):
        # 2 input streams x 2 pipeline buffers x one (H, TL) tile
        return 2 * 2 * H * tl * itemsize

    fits = [tl for tl in tiles if working_set(tl) <= input_budget] or [128]
    floor = min(min_lanes, Lp)
    fits = [tl for tl in fits if tl >= floor] or fits

    chosen = min(fits)                          # most grid steps among acceptable tiles
    for tl in sorted(fits, reverse=True):       # biggest tile that still pipelines
        if B * (Lp // tl) >= min_steps:
            chosen = tl
            break
    return chosen


def custom_loss(preds, targets):
    """preds, targets: (B, H, W, 7). Returns (total [B,1], cls [B,1], loc scalar)."""
    B, H, W, C = preds.shape
    assert targets.shape == preds.shape and C == NUM_CH

    L = W * C
    Lp = ((L + 127) // 128) * 128
    x = preds.reshape(B, H, L)        # free reshape (channel-last, contiguous)
    t = targets.reshape(B, H, L)
    if Lp != L:
        pad = ((0, 0), (0, 0), (0, Lp - L))
        x = jnp.pad(x, pad)           # zero pad -> contributes exactly 0 to both losses
        t = jnp.pad(t, pad)

    # Per-lane scale rows: row 0 = -alpha on valid classification lanes (lane % 7 == 0),
    # row 1 = 1.0 on valid localization lanes; padded lanes are 0 in both rows.
    lane = np.arange(Lp)
    valid = lane < L
    cls_row = np.where((lane % C == 0) & valid, -ALPHA, 0.0)
    loc_row = np.where((lane % C != 0) & valid, 1.0, 0.0)
    scales = jnp.asarray(np.stack([cls_row, loc_row]).astype(np.float32))  # (2, Lp)

    vmem_cap = _vmem_capacity_bytes()
    input_budget = min(vmem_cap // 4, 32 * 1024 * 1024)
    vmem_limit = min((vmem_cap * 3) // 4, 64 * 1024 * 1024)

    tl = _pick_tile_lanes(H, Lp, preds.dtype.itemsize, B, input_budget)
    n_lt = Lp // tl

    cls_part, loc_part = pl.pallas_call(
        _pixor_loss_kernel,
        grid=(B, n_lt),
        in_specs=[
            pl.BlockSpec((2, tl), lambda b, j: (0, j)),             # per-lane scales
            pl.BlockSpec((None, H, tl), lambda b, j: (b, 0, j)),    # preds   (B squeezed)
            pl.BlockSpec((None, H, tl), lambda b, j: (b, 0, j)),    # targets (B squeezed)
        ],
        out_specs=(
            pl.BlockSpec((None, None, 1, 1), lambda b, j: (b, j, 0, 0)),  # cls partials
            pl.BlockSpec((None, None, 1, 1), lambda b, j: (b, j, 0, 0)),  # loc partials
        ),
        out_shape=(
            jax.ShapeDtypeStruct((B, n_lt, 1, 1), jnp.float32),
            jax.ShapeDtypeStruct((B, n_lt, 1, 1), jnp.float32),
        ),
        compiler_params=pltpu.CompilerParams(
            dimension_semantics=("parallel", "parallel"),
            vmem_limit_bytes=vmem_limit,
        ),
    )(scales, x, t)

    cls_loss = jnp.sum(cls_part, axis=(1, 2, 3))[:, None]   # [B, 1] (reduce=False)
    loc_loss = jnp.sum(loc_part)                            # scalar (SmoothL1 'sum')
    total = cls_loss + loc_loss                             # [B, 1] broadcast, as torch
    return total, cls_loss, loc_loss


def _reference(preds, targets):
    """Pure-JAX reference mirroring the PyTorch module."""
    cls_p = preds[..., 0]
    cls_t = targets[..., 0]
    loc_p = preds[..., 1:]
    loc_t = targets[..., 1:]

    mask = (cls_t >= 0).astype(jnp.float32)
    onehot = cls_t * mask
    logits = jax.nn.softmax(cls_p, axis=1) + 1e-9
    log_data = onehot * jnp.log(logits)
    pow_data = onehot * (1.0 - logits) ** GAMMA
    fl = -ALPHA * pow_data * log_data * mask
    cls_loss = fl.reshape(fl.shape[0], -1).sum(axis=1)[:, None]

    d = loc_p - loc_t
    ad = jnp.abs(d)
    loc_loss = jnp.sum(jnp.where(ad < 1.0, 0.5 * d * d, ad - 0.5))
    return cls_loss + loc_loss, cls_loss, loc_loss


if __name__ == "__main__":
    B, H, W, C = 2, 16, 16, 7
    key = jax.random.PRNGKey(0)
    k1, k2 = jax.random.split(key)

    # deterministic inputs; targets ~N(0,1) so the >=0 ignore-mask is exercised
    preds = jax.random.normal(k1, (B, H, W, C), dtype=jnp.float32)
    targets = jax.random.normal(k2, (B, H, W, C), dtype=jnp.float32)

    total, cls_l, loc_l = custom_loss(preds, targets)
    total = jax.block_until_ready(total)
    cls_l = jax.block_until_ready(cls_l)
    loc_l = jax.block_until_ready(loc_l)

    rt, rc, rl = _reference(preds, targets)
    assert total.shape == (B, 1) and cls_l.shape == (B, 1) and loc_l.shape == ()
    assert jnp.allclose(total, rt, rtol=1e-4, atol=1e-4)
    assert jnp.allclose(cls_l, rc, rtol=1e-4, atol=1e-4)
    assert jnp.allclose(loc_l, rl, rtol=1e-4, atol=1e-4)

    print("KERNEL_OK")
</pallas_src>

<mosaic_0001>
module attributes {stable_mosaic.version = 11 : i64} {
  func.func @_pixor_loss_kernel(%arg0: i32, %arg1: i32, %arg2: memref<2x128xf32, #tpu.memory_space<vmem>>, %arg3: memref<1x16x128xf32, #tpu.memory_space<vmem>>, %arg4: memref<1x16x128xf32, #tpu.memory_space<vmem>>, %arg5: memref<1x1x1x1xf32, #tpu.memory_space<vmem>>, %arg6: memref<1x1x1x1xf32, #tpu.memory_space<vmem>>) attributes {dimension_semantics = [#tpu.dimension_semantics<parallel>, #tpu.dimension_semantics<parallel>], iteration_bounds = array<i64: 2, 1>, scalar_prefetch = 0 : i64, scratch_operands = 0 : i64, tpu.core_type = #tpu.core_type<tc>, window_params = [{transform_indices = @transform_0, window_bounds = array<i64: 2, 128>}, {transform_indices = @transform_1, window_bounds = array<i64: 1, 16, 128>}, {transform_indices = @transform_2, window_bounds = array<i64: 1, 16, 128>}, {transform_indices = @transform_3, window_bounds = array<i64: 1, 1, 1, 1>}, {transform_indices = @transform_4, window_bounds = array<i64: 1, 1, 1, 1>}]} {
    %c0 = arith.constant 0 : index
    %c0_0 = arith.constant 0 : index
    %c0_1 = arith.constant 0 : index
    %0 = vector.load %arg3[%c0, %c0_0, %c0_1] : memref<1x16x128xf32, #tpu.memory_space<vmem>>, vector<1x16x128xf32>
    %1 = vector.shape_cast %0 : vector<1x16x128xf32> to vector<16x128xf32>
    %c0_2 = arith.constant 0 : index
    %c0_3 = arith.constant 0 : index
    %c0_4 = arith.constant 0 : index
    %2 = vector.load %arg4[%c0_2, %c0_3, %c0_4] : memref<1x16x128xf32, #tpu.memory_space<vmem>>, vector<1x16x128xf32>
    %3 = vector.shape_cast %2 : vector<1x16x128xf32> to vector<16x128xf32>
    %c0_5 = arith.constant 0 : index
    %c0_6 = arith.constant 0 : index
    %4 = vector.load %arg2[%c0_5, %c0_6] : memref<2x128xf32, #tpu.memory_space<vmem>>, vector<2x128xf32>
    %5 = vector.extract_strided_slice %4 {offsets = [0, 0], sizes = [1, 128], strides = [1, 1]} : vector<2x128xf32> to vector<1x128xf32>
    %6 = vector.extract_strided_slice %4 {offsets = [1, 0], sizes = [1, 128], strides = [1, 1]} : vector<2x128xf32> to vector<1x128xf32>
    %cst = arith.constant dense<0xFF800000> : vector<128xf32>
    %7 = vector.multi_reduction <maximumf>, %1, %cst [0] : vector<16x128xf32> to vector<128xf32>
    %8 = vector.shape_cast %7 : vector<128xf32> to vector<1x128xf32>
    %9 = vector.broadcast %8 : vector<1x128xf32> to vector<16x128xf32>
    %10 = arith.subf %1, %9 : vector<16x128xf32>
    %11 = math.exp %10 : vector<16x128xf32>
    %cst_7 = arith.constant dense<0.000000e+00> : vector<128xf32>
    %12 = vector.multi_reduction <add>, %11, %cst_7 [0] : vector<16x128xf32> to vector<128xf32>
    %13 = vector.shape_cast %12 : vector<128xf32> to vector<1x128xf32>
    %cst_8 = arith.constant 1.000000e+00 : f32
    %14 = vector.broadcast %cst_8 : f32 to vector<1x128xf32>
    %15 = arith.divf %14, %13 : vector<1x128xf32>
    %16 = vector.broadcast %15 : vector<1x128xf32> to vector<16x128xf32>
    %17 = arith.mulf %11, %16 : vector<16x128xf32>
    %18 = math.log %13 : vector<1x128xf32>
    %19 = vector.broadcast %18 : vector<1x128xf32> to vector<16x128xf32>
    %20 = arith.subf %10, %19 : vector<16x128xf32>
    %cst_9 = arith.constant 0.000000e+00 : f32
    %21 = vector.broadcast %cst_9 : f32 to vector<16x128xf32>
    %22 = arith.maximumf %3, %21 : vector<16x128xf32>
    %cst_10 = arith.constant 1.000000e+00 : f32
    %23 = vector.broadcast %cst_10 : f32 to vector<16x128xf32>
    %24 = arith.subf %23, %17 : vector<16x128xf32>
    %25 = arith.mulf %22, %22 : vector<16x128xf32>
    %26 = arith.mulf %24, %24 : vector<16x128xf32>
    %27 = arith.mulf %26, %24 : vector<16x128xf32>
    %28 = arith.mulf %25, %27 : vector<16x128xf32>
    %29 = arith.mulf %28, %20 : vector<16x128xf32>
    %cst_11 = arith.constant dense<0.000000e+00> : vector<128xf32>
    %30 = vector.multi_reduction <add>, %29, %cst_11 [0] : vector<16x128xf32> to vector<128xf32>
    %31 = vector.shape_cast %30 : vector<128xf32> to vector<1x128xf32>
    %32 = arith.mulf %31, %5 : vector<1x128xf32>
    %cst_12 = arith.constant dense<0.000000e+00> : vector<1xf32>
    %33 = vector.multi_reduction <add>, %32, %cst_12 [1] : vector<1x128xf32> to vector<1xf32>
    %34 = vector.shape_cast %33 : vector<1xf32> to vector<1x1xf32>
    %c0_13 = arith.constant 0 : index
    %c0_14 = arith.constant 0 : index
    %c0_15 = arith.constant 0 : index
    %c0_16 = arith.constant 0 : index
    %35 = vector.load %arg5[%c0_13, %c0_14, %c0_15, %c0_16] : memref<1x1x1x1xf32, #tpu.memory_space<vmem>>, vector<1x1x1x1xf32>
    %36 = vector.shape_cast %35 : vector<1x1x1x1xf32> to vector<1x1xf32>
    %37 = vector.shape_cast %34 : vector<1x1xf32> to vector<1x1x1x1xf32>
    tpu.vector_store %arg5[%c0_13, %c0_14, %c0_15, %c0_16], %37 {strides = array<i32>} : memref<1x1x1x1xf32, #tpu.memory_space<vmem>>, vector<1x1x1x1xf32>,
    %38 = arith.subf %1, %3 : vector<16x128xf32>
    %39 = math.absf %38 : vector<16x128xf32>
    %cst_17 = arith.constant 1.000000e+00 : f32
    %40 = vector.broadcast %cst_17 : f32 to vector<16x128xf32>
    %41 = arith.cmpf olt, %39, %40 : vector<16x128xf32>
    %42 = arith.mulf %38, %38 : vector<16x128xf32>
    %cst_18 = arith.constant 5.000000e-01 : f32
    %43 = vector.broadcast %cst_18 : f32 to vector<16x128xf32>
    %44 = arith.mulf %43, %42 : vector<16x128xf32>
    %cst_19 = arith.constant 5.000000e-01 : f32
    %45 = vector.broadcast %cst_19 : f32 to vector<16x128xf32>
    %46 = arith.subf %39, %45 : vector<16x128xf32>
    %47 = arith.select %41, %44, %46 : vector<16x128xi1>, vector<16x128xf32>
    %cst_20 = arith.constant dense<0.000000e+00> : vector<128xf32>
    %48 = vector.multi_reduction <add>, %47, %cst_20 [0] : vector<16x128xf32> to vector<128xf32>
    %49 = vector.shape_cast %48 : vector<128xf32> to vector<1x128xf32>
    %50 = arith.mulf %49, %6 : vector<1x128xf32>
    %cst_21 = arith.constant dense<0.000000e+00> : vector<1xf32>
    %51 = vector.multi_reduction <add>, %50, %cst_21 [1] : vector<1x128xf32> to vector<1xf32>
    %52 = vector.shape_cast %51 : vector<1xf32> to vector<1x1xf32>
    %c0_22 = arith.constant 0 : index
    %c0_23 = arith.constant 0 : index
    %c0_24 = arith.constant 0 : index
    %c0_25 = arith.constant 0 : index
    %53 = vector.load %arg6[%c0_22, %c0_23, %c0_24, %c0_25] : memref<1x1x1x1xf32, #tpu.memory_space<vmem>>, vector<1x1x1x1xf32>
    %54 = vector.shape_cast %53 : vector<1x1x1x1xf32> to vector<1x1xf32>
    %55 = vector.shape_cast %52 : vector<1x1xf32> to vector<1x1x1x1xf32>
    tpu.vector_store %arg6[%c0_22, %c0_23, %c0_24, %c0_25], %55 {strides = array<i32>} : memref<1x1x1x1xf32, #tpu.memory_space<vmem>>, vector<1x1x1x1xf32>,
    return
  }
  func.func @transform_0(%arg0: i32, %arg1: i32) -> (i32, i32) {
    %c0_i32 = arith.constant 0 : i32
    %c0_i32_0 = arith.constant 0 : i32
    return %c0_i32, %arg1 : i32, i32
  }
  func.func @transform_1(%arg0: i32, %arg1: i32) -> (i32, i32, i32) {
    %c0_i32 = arith.constant 0 : i32
    %c0_i32_0 = arith.constant 0 : i32
    return %arg0, %c0_i32, %arg1 : i32, i32, i32
  }
  func.func @transform_2(%arg0: i32, %arg1: i32) -> (i32, i32, i32) {
    %c0_i32 = arith.constant 0 : i32
    %c0_i32_0 = arith.constant 0 : i32
    return %arg0, %c0_i32, %arg1 : i32, i32, i32
  }
  func.func @transform_3(%arg0: i32, %arg1: i32) -> (i32, i32, i32, i32) {
    %c0_i32 = arith.constant 0 : i32
    %c0_i32_0 = arith.constant 0 : i32
    %c0_i32_1 = arith.constant 0 : i32
    return %arg0, %arg1, %c0_i32, %c0_i32_0 : i32, i32, i32, i32
  }
  func.func @transform_4(%arg0: i32, %arg1: i32) -> (i32, i32, i32, i32) {
    %c0_i32 = arith.constant 0 : i32
    %c0_i32_0 = arith.constant 0 : i32
    %c0_i32_1 = arith.constant 0 : i32
    return %arg0, %arg1, %c0_i32, %c0_i32_0 : i32, i32, i32, i32
  }
}

</mosaic_0001>

<bundles_post_ra>
// kernel: tpu_custom_call.1
= control target key start
LH: loop header
LB: loop body
LE: loop exit
PB: predicated region body
PF: predicated region fallthrough
CT: control target
= control target key end

     0   :  { %10 = vsyncpa [#allocation3], 0  ;;  %s978_s0 = inlined_call_operand.hbm [shape: f32[2,128], index: 0, kind: input, shape index: {}]   ;;  %s979_s1 = inlined_call_operand.hbm [shape: f32[2,16,128], index: 1, kind: input, shape index: {}]   ;;  %s980_s2 = inlined_call_operand.hbm [shape: f32[2,16,128], index: 2, kind: input, shape index: {}]   ;;  %s981_s3 = inlined_call_operand.vmem [shape: f32[2,1,1,1], index: 3, kind: output, shape index: {0}]   ;;  %s982_s4 = inlined_call_operand.vmem [shape: f32[2,1,1,1], index: 4, kind: output, shape index: {1}]  }
   0x1   :  { %11 = vsyncpa [#allocation5], 0 }
   0x2   :  { %13 = vsyncpa [#allocation5 + $0x1], 0  ;;  %s823_s15 = smov 0   ;;  %s825_s16 = smov 0  }
   0x3   :  { %s827_s17 = smov 0   ;;  %s829_s18 = smov 0  }
   0x4   :  { %s831_s19 = smov 0   ;;  %s833_s20 = smov 0  }
   0x5 LB: > { %s31_s21 = sadd.s32 1, %s787_s19  ;;  %s66_s22 = sadd.s32 1, %s779_s17  ;;  %s791_s20 = sphi %s833_s20, %s19_s20   ;;  %s787_s19 = sphi %s831_s19, %s991_s19   ;;  %s783_s18 = sphi %s829_s18, %s990_s18   ;;  %s779_s17 = sphi %s827_s17, %s989_s17   ;;  %s775_s16 = sphi %s825_s16, %s988_s16   ;;  %s771_s15 = sphi %s823_s15, %s987_s15  }
   0x6   : > { %p33_p0 = scmp.ge.s32.totalorder %s31_s21, 2  ;;  %p73_p1 = scmp.ne.s32.totalorder %s779_s17, %s775_s16 }
   0x7   : > { %p74_p2 = scmp.eq.s32.totalorder %s791_s20, 0  ;;  %p594_p4 = scmp.lt.s32.totalorder %s791_s20, 2 }
   0x8   : > { %s993_s21 = smov (%p33_p0, %s31_s21), 0  ;;  %s200_s24 = sand.u32 1, %s791_s20  }
   0x9   : > { %p75_p3 = por %p74_p2, %p73_p1  ;;  %s61_s23 = ssub.s32 %s787_s19, %s993_s21 }
   0xa   : > { %p64_p5 = scmp.eq.s32.totalorder %s61_s23, 0  ;;  %s202_s25 = sand.u32 1, %s779_s17  }
   0xb   : > { %s572_s26 = sshll.u32 %s787_s19, 8  ;;  %s558_s28 = sshll.u32 %s202_s25, 4 }
   0xc   : > { %s867_s27 = scalar_select %p64_p5, %s779_s17, %s66_s22  }
   0xd   : > { %s211_s5 = scalar_lea.hbm %s979_s1, %s572_s26  ;;  %p874_p6 = pnand %p594_p4, %p75_p3 }
   0xe   : > { %s204_s7 = scalar_lea.vmem [#allocation4], %s558_s28  ;;  %s878_s9 = scalar_lea.sflag [#allocation5], %s200_s24 }
   0xf   : > { %s212_s8 = sshll.u32 %s204_s7, 4  ;;  %p657_p7 = pneg %p874_p6  ;;  %s213_s8 = int_to_ptr.vmem [resolvable:$true] %s212_s8 }
  0x10   : > { %s668_s10 = scalar_lea.vmem %s213_s8, 256  ;;  %s793_s11 = smov [#allocation4]  }
  0x11   : > { %p669_p8 = scmp.ne.s32.totalorder %s213_s8, %s668_s10  ;;  %s673_s12 = sshll.u32 %s793_s11, 4  ;;  %s674_s12 = int_to_ptr.vmem [resolvable:$false] %s673_s12 }
  0x12   : > { %s675_s13 = scalar_lea.vmem %s674_s12, 512  ;;  %p676_p11 = scmp.lt.s32.totalorder %s213_s8, %s674_s12 }
  0x13   : > { %p671_p9 = pnand %p669_p8, %p657_p7  ;;  %p677_p12 = scmp.lt.s32.totalorder %s675_s13, %s668_s10 }
  0x15   : > { %p672_p10 = pneg %p671_p9  ;;  %p678_p13 = por %p677_p12, %p676_p11 }
  0x17   : > { %p679_p0 = pnand %p678_p13, %p672_p10 }
  0x19   : > { %682 = shalt.err (!%p679_p0)
}
  0x1a   : > { %s794_s14 = smov 128   ;;  %s795_s22 = smov 8  }
  0x1b   : > { %589 = dma.hbm_to_vmem [thread:$0]  (!%p874_p6), %s211_s5, 256, %s213_s8, %s878_s9, %s794_s14, %s794_s14, %s795_s22  }
  0x1c   : > { %s896_s25 = scalar_lea.hbm %s980_s2, %s572_s26  ;;  %s226_s29 = scalar_lea.vmem [#allocation6], %s558_s28 }
  0x1d   : > { %s234_s30 = sshll.u32 %s226_s29, 4  ;;  %s553_s7 = sadd.s32 4294967295, %s791_s20   ;;  %s235_s30 = int_to_ptr.vmem [resolvable:$true] %s234_s30 }
  0x1e   : > { %p79_p1 = scmp.ne.s32.totalorder %s775_s16, %s771_s15  ;;  %p903_p2 = scmp.eq.s32.totalorder %s553_s7, 0 }
  0x1f   : > { %p555_p3 = scmp.ge.s32.totalorder %s791_s20, 1  ;;  %p174_p4 = scmp.lt.s32.totalorder %s791_s20, 3 }
  0x20   : > { %p911_p5 = por %p903_p2, %p79_p1  ;;  %s796_s28 = smov [#allocation2]  }
  0x21   : > { %p915_p8 = pnand %p555_p3, %p174_p4  ;;  %s189_s15 = sshll.u32 %s796_s28, 4  ;;  %s190_s15 = int_to_ptr.vmem [resolvable:$true] %s189_s15 }
  0x22   : > { %s696_s8 = scalar_lea.vmem %s235_s30, 256  ;;  %s797_s11 = smov [#allocation6]  }
  0x23   : > { %p582_p9 = pneg %p915_p8  ;;  %p697_p10 = scmp.ne.s32.totalorder %s235_s30, %s696_s8 }
  0x24   : > { %s701_s12 = sshll.u32 %s797_s11, 4  ;;  %s702_s12 = int_to_ptr.vmem [resolvable:$false] %s701_s12 }
  0x25   : > { %p699_p11 = pnand %p697_p10, %p657_p7  ;;  %s703_s13 = scalar_lea.vmem %s702_s12, 512 }
  0x26   : > { %p704_p13 = scmp.lt.s32.totalorder %s235_s30, %s702_s12  ;;  %p705_p0 = scmp.lt.s32.totalorder %s703_s13, %s696_s8 }
  0x27   : > { %p700_p12 = pneg %p699_p11 }
  0x28   : > { %p706_p1 = por %p705_p0, %p704_p13 }
  0x2a   : > { %p707_p3 = pnand %p706_p1, %p700_p12 }
  0x2c   : > { %710 = shalt.err (!%p707_p3)
}
  0x2d   : > { %592 = dma.hbm_to_vmem [thread:$0]  (!%p874_p6), %s896_s25, 256, %s235_s30, %s878_s9, %s794_s14, %s794_s14, %s795_s22  }
  0x2e   : > { %p583_p7 = pnand %p582_p9, %p903_p2  ;;  %s722_s23 = scalar_lea.vmem %s190_s15, 32 }
  0x2f   : > { %p723_p10 = scmp.ne.s32.totalorder %s190_s15, %s722_s23  ;;  %p730_p13 = scmp.lt.s32.totalorder %s190_s15, %s190_s15 }
  0x30   : > { %p713_p4 = pneg %p583_p7  ;;  %p731_p0 = scmp.lt.s32.totalorder %s722_s23, %s722_s23 }
  0x32   : > { %p725_p11 = pnand %p723_p10, %p713_p4  ;;  %p732_p1 = por %p731_p0, %p730_p13 }
  0x34   : > { %p726_p12 = pneg %p725_p11 }
  0x36   : > { %p733_p3 = pnand %p732_p1, %p726_p12 }
  0x38   : > { %736 = shalt.err (!%p733_p3)
}
  0x39   : > { %585 = dma.hbm_to_vmem [thread:$0]  (!%p583_p7), %s978_s0, 32, %s190_s15, [#allocation3]  }
  0x3a   : > { %246 = sbr.rel (%p915_p8) target bundleno = 302 (0x12e), region = 32 }
  0x3f   : > { %762 = dma.done.wait (%p903_p2), [#allocation3], 32  }
  0x40   : > { %764 = vsyncadd (%p903_p2), [#allocation3], 4294967264  ;;  %s252_s9 = sand.u32 1, %s553_s7   ;;  %s254_s14 = sand.u32 1, %s775_s16  }
  0x41   : > { %s566_s22 = sshll.u32 %s254_s14, 4  ;;  %s253_s25 = scalar_lea.sflag [#allocation5], %s252_s9 }
  0x42   : > { %s256_s29 = scalar_lea.vmem [#allocation4], %s566_s22 }
  0x43   : > { %766 = dma.done.wait (%p911_p5), %s253_s25, 512  }
  0x44   : > { %768 = vsyncadd (%p911_p5), %s253_s25, 4294966784  ;;  %v314_v0 = vld [vmem:[%s256_s29] sm:$0xff]  ;;  %v315_v1 = vld [vmem:[%s256_s29 + $0x8] sm:$0xff]  ;;  %s265_s30 = scalar_lea.vmem [#allocation6], %s566_s22  ;;  %vm369_vm2 = vcmask 1040384   ;;  %vm397_vm3 = vcmask 1041409  }
  0x45   : > { %v316_v2 = vld [vmem:[%s265_s30] sm:$0xff]  ;;  %v317_v3 = vld [vmem:[%s265_s30 + $0x8] sm:$0xff]  ;;  %v319_v4 = vmax.f32 %v314_v0, %v315_v1  ;;  %p302_p6 = scmp.lt.s32.totalorder %s783_s18, 1  ;;  %vm373_vm4 = vcmask 0   ;;  %vm401_vm5 = vcmask 1025  }
  0x46   : > { %v375_v5 = vsub.f32 %v314_v0, %v316_v2  ;;  %v376_v6 = vsub.f32 %v315_v1, %v317_v3  ;;  %v347_v41 = vmax.f32 %v316_v2, 0.0  ;;  %v348_v42 = vmax.f32 %v317_v3, 0.0 }
  0x47   : > { %v320_v7 = vrot.slane %v319_v4, 4  ;;  %s995_s18 = smov (!%p302_p6, %s783_s18), 1 }
  0x48   : > { %v377_v8 = vand.u32 2147483647, %v375_v5  ;;  %v381_v9 = vmul.f32 %v375_v5, %v375_v5  ;;  %v378_v10 = vand.u32 2147483647, %v376_v6  ;;  %v382_v11 = vmul.f32 %v376_v6, %v376_v6  ;;  %v318_v6 = vld [vmem:[#allocation2] sm:$0x3]  ;;  %s307_s5 = scalar_lea.vmem %s981_s3, %s995_s18  ;;  %s313_s15 = scalar_lea.vmem %s982_s4, %s995_s18 }
  0x49   : > { %v321_v12 = vmax.f32 %v319_v4, %v320_v7  ;;  %v351_v47 = vmul.f32 %v347_v41, %v347_v41  ;;  %v352_v48 = vmul.f32 %v348_v42, %v348_v42 }
  0x4a   : > { %vm379_vm0 = vcmp.lt.f32.partialorder %v377_v8, 1.0  ;;  %v383_v13 = vmul.f32 0.5, %v381_v9  ;;  %v568_v14 = vadd.f32 -0.5, %v377_v8  ;;  %vm380_vm1 = vcmp.lt.f32.partialorder %v378_v10, 1.0 }
  0x4b   : > { %v384_v15 = vmul.f32 0.5, %v382_v11  ;;  %v569_v16 = vadd.f32 -0.5, %v378_v10  ;;  %v322_v17 = vrot.slane %v321_v12, 2 }
  0x4c   : > { %v387_v18 = vsel %vm379_vm0, %v383_v13, %v568_v14 }
  0x4d   : > { %v388_v19 = vsel %vm380_vm1, %v384_v15, %v569_v16  ;;  %v323_v20 = vmax.f32 %v321_v12, %v322_v17 }
  0x4e   : > { %v389_v21 = vadd.f32 %v388_v19, %v387_v18 }
  0x4f   : > { %v324_v22 = vrot.slane %v323_v20, 1 }
  0x50   : > { %v390_v43 = vrot.slane %v389_v21, 4 }
  0x51   : > { %v325_v23 = vmax.f32 %v323_v20, %v324_v22 }
  0x52   : > { %v391_v51 = vadd.f32 %v390_v43, %v389_v21 }
  0x53   : > { %v326_v24 = vsub.f32 %v314_v0, %v325_v23  ;;  %v327_v25 = vsub.f32 %v315_v1, %v325_v23 }
  0x54   : > { %v392_v60 = vrot.slane %v391_v51, 2 }
  0x55   : > { %v328_v26 = vmul.f32 1.442695, %v326_v24  ;;  %v330_v27 = vmul.f32 1.442695, %v327_v25 }
  0x56   : > { %v393_v63 = vadd.f32 %v392_v60, %v391_v51 }
  0x57   : > { %647 = vpow2.f32 %v328_v26 }
  0x58   : > { %649 = vpow2.f32 %v330_v27  ;;  %v394_v2 = vrot.slane %v393_v63, 1 }
  0x5a   : > { %v395_v5 = vadd.f32 %v394_v2, %v393_v63 }
  0x5c   : > { %v396_v9 = vmul.f32 %v395_v5, %v318_v6 }
  0x5e   : > { %v398_v11 = vsel %vm397_vm3, %v396_v9, 0.0 }
  0x64   : > { %v648_v28 = vpop.eup %647 }
  0x65   : > { %v650_v29 = vpop.eup %649 }
  0x66   : > { %v332_v30 = vadd.f32 %v650_v29, %v648_v28 }
  0x68   : > { %v333_v31 = vrot.slane %v332_v30, 4 }
  0x6a   : > { %v334_v32 = vadd.f32 %v333_v31, %v332_v30 }
  0x6c   : > { %v335_v33 = vrot.slane %v334_v32, 2 }
  0x6e   : > { %v336_v34 = vadd.f32 %v335_v33, %v334_v32 }
  0x70   : > { %v337_v35 = vrot.slane %v336_v34, 1 }
  0x72   : > { %v338_v36 = vadd.f32 %v337_v35, %v336_v34 }
  0x74   : > { %651 = vrcp.f32 %v338_v36 }
  0x75   : > { %653 = vlog2.f32 %v338_v36 }
  0x81   : > { %v652_v37 = vpop.eup %651 }
  0x82   : > { %v654_v38 = vpop.eup %653  ;;  %v341_v39 = vmul.f32 %v652_v37, %v648_v28  ;;  %v342_v40 = vmul.f32 %v652_v37, %v650_v29 }
  0x83   : > { %v344_v44 = vmul.f32 0.6931472, %v654_v38 }
  0x84   : > { %v349_v45 = vsub.f32 1.0, %v341_v39  ;;  %v350_v46 = vsub.f32 1.0, %v342_v40 }
  0x85   : > { %v345_v52 = vsub.f32 %v326_v24, %v344_v44  ;;  %v346_v53 = vsub.f32 %v327_v25, %v344_v44 }
  0x86   : > { %v353_v49 = vmul.f32 %v349_v45, %v349_v45  ;;  %v354_v50 = vmul.f32 %v350_v46, %v350_v46 }
  0x88   : > { %v355_v54 = vmul.f32 %v353_v49, %v349_v45  ;;  %v356_v55 = vmul.f32 %v354_v50, %v350_v46 }
  0x8a   : > { %v357_v56 = vmul.f32 %v355_v54, %v351_v47  ;;  %v358_v57 = vmul.f32 %v356_v55, %v352_v48 }
  0x8c   : > { %v359_v58 = vmul.f32 %v357_v56, %v345_v52  ;;  %v360_v59 = vmul.f32 %v358_v57, %v346_v53 }
  0x8e   : > { %v361_v61 = vadd.f32 %v360_v59, %v359_v58 }
  0x90   : > { %v362_v62 = vrot.slane %v361_v61, 4 }
  0x92   : > { %v363_v0 = vadd.f32 %v362_v62, %v361_v61 }
  0x94   : > { %v364_v1 = vrot.slane %v363_v0, 2 }
  0x96   : > { %v365_v3 = vadd.f32 %v364_v1, %v363_v0 }
  0x98   : > { %v366_v4 = vrot.slane %v365_v3, 1 }
  0x9a   : > { %v367_v7 = vadd.f32 %v366_v4, %v365_v3 }
  0x9c   : > { %v368_v8 = vmul.f32 %v367_v7, %v318_v6 }
  0x9e   : > { %v370_v10 = vsel %vm369_vm2, %v368_v8, 0.0 }
  0x9f   : > { %371 = vadd.xlane.f32.xlu0 %v370_v10 }
  0xa3   : > { %399 = vadd.xlane.f32.xlu0 %v398_v11 }
 0x128   : > { %v372_v12 = vpop.xlane.xlu0 %371 }
 0x129   : > { %374 = vst.msk [vmem:[%s307_s5] sm:$0x1] %vm373_vm4, %v372_v12 }
 0x12c   : > { %v400_v13 = vpop.xlane.xlu0 %399 }
 0x12d   : > { %402 = vst.msk [vmem:[%s313_s15 - $0x1] sm:$0x2] %vm401_vm5, %v400_v13 }
 0x12e PF: > { %s19_s20 = sadd.s32 1, %s791_s20   ;;  %s987_s15 = smov %s775_s16 }
 0x12f   : > { %p16_p2 = scmp.ge.s32.totalorder %s19_s20, 4   ;;  %s988_s16 = smov %s779_s17 }
 0x130   : > { %s989_s17 = smov %s867_s27  ;;  %s990_s18 = smov %s787_s19 }
 0x131   : > { %s991_s19 = smov %s993_s21  ;;  %18 = sbr.rel (!%p16_p2) target bundleno = 5 (0x5), region = 101 }
 0x136   :  { %444 = vsyncpa [#allocation3], 1 }
 0x137   :  { %446 = vsyncpa [#allocation3 + $0x1], 1 }
 0x138   :  { %447 = vsyncpa [#allocation5], 1 }
 0x139   :  { %449 = vsyncpa [#allocation5 + $0x1], 1 }

</bundles_post_ra>
